<compile_context>
chip_gen: v7x
topology: tpu7x:2x2x1
jax: 0.10.0
libtpu: 0.0.40
codegen_flags: <defaults>
</compile_context>

<pallas_src>
import jax
import jax.numpy as jnp
from jax.experimental import pallas as pl
from jax.experimental.pallas import tpu as pltpu


def _outconv_kernel(x_ref, w_ref, b_ref, o_ref):
    """One (pixel tile, batch image) grid step.

    x_ref: (1, C_in,  TR, 128)  VMEM  sublane-dense input pixel tile
    w_ref: (C_out, C_in)        SMEM  1x1 conv weights (scalars)
    b_ref: (C_out,)             SMEM  bias (scalars)
    o_ref: (1, C_out, TR, 128)  VMEM  lane-dense output pixel tile
    """
    c_out, c_in = w_ref.shape
    for oc in range(c_out):                 # tiny channel counts: static unroll
        # Bias is folded into the first FMA (no zeros-init + extra add pass).
        acc = x_ref[0, 0].astype(jnp.float32) * w_ref[oc, 0] + b_ref[oc]
        for ic in range(1, c_in):
            acc = acc + w_ref[oc, ic] * x_ref[0, ic].astype(jnp.float32)
        # Direct per-channel store: no concatenate, no intermediate copy.
        o_ref[0, oc] = acc.astype(o_ref.dtype)


def _pick_tile_rows(rows, cap_rows):
    """Pick tile size (in 128-lane rows) and the padded row count."""
    cap_rows = max(8, cap_rows)
    if rows <= cap_rows:
        # One pixel tile per image; tr == full dim, so (8,128) rule is satisfied.
        return rows, rows
    # Prefer a multiple-of-8 divisor of `rows` (no padding, no ragged tile).
    for d in range(cap_rows - cap_rows % 8, 7, -8):
        if rows % d == 0:
            return d, rows
    # Ragged fallback: pad the row axis up to a tile multiple.
    tr = cap_rows - cap_rows % 8
    return tr, pl.cdiv(rows, tr) * tr


def outconv_pallas(x_nchw, weight, bias, *, max_tile_pixels=32768,
                   vmem_budget_bytes=8 * 1024 * 1024):
    """1x1 Conv2d forward (PyTorch OutConv equivalent).

    x_nchw : (N, C_in, H, W)      float32
    weight : (C_out, C_in, 1, 1)  float32 (PyTorch Conv2d layout)
    bias   : (C_out,)             float32
    returns: (N, C_out, H, W)     float32
    """
    N, C_in, H, W = x_nchw.shape
    C_out = weight.shape[0]
    HW = H * W

    # Pixel axis viewed as (rows, 128) lanes.
    rows = pl.cdiv(HW, 128)

    # VMEM budget per 128-lane pixel row: f32 in + out blocks, double-buffered.
    # (Dense layout -> no sublane-padding term needed.)  8 MiB default stays
    # well under scoped-VMEM defaults on v5e (16 MiB) and v6e/v7x (32 MiB).
    bytes_per_row = (C_in + C_out) * 128 * 4 * 2
    budget_rows = max(8, vmem_budget_bytes // bytes_per_row)
    cap_rows = min(max(8, max_tile_pixels // 128), budget_rows)

    tr, rows_pad = _pick_tile_rows(rows, cap_rows)
    hw_pad = rows_pad * 128

    x3 = x_nchw.reshape(N, C_in, HW)            # free reshape, no transpose
    if hw_pad != HW:                            # only for ragged spatial sizes
        x3 = jnp.pad(x3, ((0, 0), (0, 0), (0, hw_pad - HW)))
    x4 = x3.reshape(N, C_in, rows_pad, 128)     # free reshape (row-major split)

    w_mat = weight.reshape(C_out, C_in).astype(jnp.float32)   # scalars -> SMEM
    b_vec = bias.reshape(C_out).astype(jnp.float32)           # scalars -> SMEM

    # Most-blocks axis leads so v7x's 2 TensorCores both stay busy.
    grid = (rows_pad // tr, N)

    out = pl.pallas_call(
        _outconv_kernel,
        out_shape=jax.ShapeDtypeStruct((N, C_out, rows_pad, 128), x_nchw.dtype),
        grid_spec=pltpu.PrefetchScalarGridSpec(
            num_scalar_prefetch=0,
            grid=grid,
            in_specs=[
                pl.BlockSpec((1, C_in, tr, 128), lambda j, n: (n, 0, j, 0)),
                pl.BlockSpec(memory_space=pltpu.MemorySpace.SMEM),
                pl.BlockSpec(memory_space=pltpu.MemorySpace.SMEM),
            ],
            out_specs=pl.BlockSpec((1, C_out, tr, 128), lambda j, n: (n, 0, j, 0)),
        ),
        compiler_params=pltpu.CompilerParams(
            dimension_semantics=("parallel", "parallel"),
        ),
    )(x4, w_mat, b_vec)

    out = out.reshape(N, C_out, hw_pad)
    if hw_pad != HW:
        out = out[:, :, :HW]                    # drop zero-padded pixels
    return out.reshape(N, C_out, H, W)          # free reshape


if __name__ == "__main__":
    key = jax.random.PRNGKey(0)
    k_x, k_w, k_b = jax.random.split(key, 3)

    # Small shapes consistent with the module: batch=2, in_channels=4,
    # out_channels=3, spatial 16x16.
    N, C_in, C_out, H, W = 2, 4, 3, 16, 16

    x = jax.random.normal(k_x, (N, C_in, H, W), dtype=jnp.float32)
    # Deterministic synthetic parameters (PyTorch Conv2d weight layout).
    fan_in = C_in  # kernel_size=1
    bound = 1.0 / jnp.sqrt(fan_in)
    weight = jax.random.uniform(
        k_w, (C_out, C_in, 1, 1), minval=-bound, maxval=bound, dtype=jnp.float32
    )
    bias = jax.random.uniform(
        k_b, (C_out,), minval=-bound, maxval=bound, dtype=jnp.float32
    )

    y = outconv_pallas(x, weight, bias)
    y = jax.block_until_ready(y)

    # Correctness check against plain-JAX reference.
    y_ref = jnp.einsum("nihw,oi->nohw", x, weight.reshape(C_out, C_in)) + bias[
        None, :, None, None
    ]
    assert y.shape == (N, C_out, H, W)
    assert jnp.allclose(y, y_ref, atol=1e-5, rtol=1e-5)

    print("KERNEL_OK")
</pallas_src>

<mosaic_0001>
module attributes {stable_mosaic.version = 11 : i64} {
  func.func @_outconv_kernel(%arg0: i32, %arg1: i32, %arg2: memref<1x4x2x128xf32, #tpu.memory_space<vmem>>, %arg3: memref<3x4xf32, #tpu.memory_space<smem>>, %arg4: memref<3xf32, #tpu.memory_space<smem>>, %arg5: memref<1x3x2x128xf32, #tpu.memory_space<vmem>>) attributes {dimension_semantics = [#tpu.dimension_semantics<parallel>, #tpu.dimension_semantics<parallel>], iteration_bounds = array<i64: 1, 2>, scalar_prefetch = 0 : i64, scratch_operands = 0 : i64, tpu.core_type = #tpu.core_type<tc>, window_params = [{transform_indices = @transform_0, window_bounds = array<i64: 1, 4, 2, 128>}, {transform_indices = @transform_1, window_bounds = array<i64: 3, 4>}, {transform_indices = @transform_2, window_bounds = array<i64: 3>}, {transform_indices = @transform_3, window_bounds = array<i64: 1, 3, 2, 128>}]} {
    %c0 = arith.constant 0 : index
    %c0_0 = arith.constant 0 : index
    %c0_1 = arith.constant 0 : index
    %c0_2 = arith.constant 0 : index
    %0 = vector.load %arg2[%c0, %c0_0, %c0_1, %c0_2] : memref<1x4x2x128xf32, #tpu.memory_space<vmem>>, vector<1x1x2x128xf32>
    %1 = vector.shape_cast %0 : vector<1x1x2x128xf32> to vector<2x128xf32>
    %c0_3 = arith.constant 0 : index
    %c0_4 = arith.constant 0 : index
    %2 = memref.load %arg3[%c0_3, %c0_4] : memref<3x4xf32, #tpu.memory_space<smem>>
    %3 = vector.broadcast %2 : f32 to vector<2x128xf32>
    %4 = arith.mulf %1, %3 : vector<2x128xf32>
    %c0_5 = arith.constant 0 : index
    %5 = memref.load %arg4[%c0_5] : memref<3xf32, #tpu.memory_space<smem>>
    %6 = vector.broadcast %5 : f32 to vector<2x128xf32>
    %7 = arith.addf %4, %6 : vector<2x128xf32>
    %c0_6 = arith.constant 0 : index
    %c1 = arith.constant 1 : index
    %8 = memref.load %arg3[%c0_6, %c1] : memref<3x4xf32, #tpu.memory_space<smem>>
    %c0_7 = arith.constant 0 : index
    %c1_8 = arith.constant 1 : index
    %c0_9 = arith.constant 0 : index
    %c0_10 = arith.constant 0 : index
    %9 = vector.load %arg2[%c0_7, %c1_8, %c0_9, %c0_10] : memref<1x4x2x128xf32, #tpu.memory_space<vmem>>, vector<1x1x2x128xf32>
    %10 = vector.shape_cast %9 : vector<1x1x2x128xf32> to vector<2x128xf32>
    %11 = vector.broadcast %8 : f32 to vector<2x128xf32>
    %12 = arith.mulf %11, %10 : vector<2x128xf32>
    %13 = arith.addf %7, %12 : vector<2x128xf32>
    %c0_11 = arith.constant 0 : index
    %c2 = arith.constant 2 : index
    %14 = memref.load %arg3[%c0_11, %c2] : memref<3x4xf32, #tpu.memory_space<smem>>
    %c0_12 = arith.constant 0 : index
    %c2_13 = arith.constant 2 : index
    %c0_14 = arith.constant 0 : index
    %c0_15 = arith.constant 0 : index
    %15 = vector.load %arg2[%c0_12, %c2_13, %c0_14, %c0_15] : memref<1x4x2x128xf32, #tpu.memory_space<vmem>>, vector<1x1x2x128xf32>
    %16 = vector.shape_cast %15 : vector<1x1x2x128xf32> to vector<2x128xf32>
    %17 = vector.broadcast %14 : f32 to vector<2x128xf32>
    %18 = arith.mulf %17, %16 : vector<2x128xf32>
    %19 = arith.addf %13, %18 : vector<2x128xf32>
    %c0_16 = arith.constant 0 : index
    %c3 = arith.constant 3 : index
    %20 = memref.load %arg3[%c0_16, %c3] : memref<3x4xf32, #tpu.memory_space<smem>>
    %c0_17 = arith.constant 0 : index
    %c3_18 = arith.constant 3 : index
    %c0_19 = arith.constant 0 : index
    %c0_20 = arith.constant 0 : index
    %21 = vector.load %arg2[%c0_17, %c3_18, %c0_19, %c0_20] : memref<1x4x2x128xf32, #tpu.memory_space<vmem>>, vector<1x1x2x128xf32>
    %22 = vector.shape_cast %21 : vector<1x1x2x128xf32> to vector<2x128xf32>
    %23 = vector.broadcast %20 : f32 to vector<2x128xf32>
    %24 = arith.mulf %23, %22 : vector<2x128xf32>
    %25 = arith.addf %19, %24 : vector<2x128xf32>
    %c0_21 = arith.constant 0 : index
    %c0_22 = arith.constant 0 : index
    %c0_23 = arith.constant 0 : index
    %c0_24 = arith.constant 0 : index
    %26 = vector.load %arg5[%c0_21, %c0_22, %c0_23, %c0_24] : memref<1x3x2x128xf32, #tpu.memory_space<vmem>>, vector<1x1x2x128xf32>
    %27 = vector.shape_cast %26 : vector<1x1x2x128xf32> to vector<2x128xf32>
    %28 = vector.shape_cast %25 : vector<2x128xf32> to vector<1x1x2x128xf32>
    tpu.vector_store %arg5[%c0_21, %c0_22, %c0_23, %c0_24], %28 {strides = array<i32>} : memref<1x3x2x128xf32, #tpu.memory_space<vmem>>, vector<1x1x2x128xf32>,
    %c0_25 = arith.constant 0 : index
    %c0_26 = arith.constant 0 : index
    %c0_27 = arith.constant 0 : index
    %c0_28 = arith.constant 0 : index
    %29 = vector.load %arg2[%c0_25, %c0_26, %c0_27, %c0_28] : memref<1x4x2x128xf32, #tpu.memory_space<vmem>>, vector<1x1x2x128xf32>
    %30 = vector.shape_cast %29 : vector<1x1x2x128xf32> to vector<2x128xf32>
    %c1_29 = arith.constant 1 : index
    %c0_30 = arith.constant 0 : index
    %31 = memref.load %arg3[%c1_29, %c0_30] : memref<3x4xf32, #tpu.memory_space<smem>>
    %32 = vector.broadcast %31 : f32 to vector<2x128xf32>
    %33 = arith.mulf %30, %32 : vector<2x128xf32>
    %c1_31 = arith.constant 1 : index
    %34 = memref.load %arg4[%c1_31] : memref<3xf32, #tpu.memory_space<smem>>
    %35 = vector.broadcast %34 : f32 to vector<2x128xf32>
    %36 = arith.addf %33, %35 : vector<2x128xf32>
    %c1_32 = arith.constant 1 : index
    %c1_33 = arith.constant 1 : index
    %37 = memref.load %arg3[%c1_32, %c1_33] : memref<3x4xf32, #tpu.memory_space<smem>>
    %c0_34 = arith.constant 0 : index
    %c1_35 = arith.constant 1 : index
    %c0_36 = arith.constant 0 : index
    %c0_37 = arith.constant 0 : index
    %38 = vector.load %arg2[%c0_34, %c1_35, %c0_36, %c0_37] : memref<1x4x2x128xf32, #tpu.memory_space<vmem>>, vector<1x1x2x128xf32>
    %39 = vector.shape_cast %38 : vector<1x1x2x128xf32> to vector<2x128xf32>
    %40 = vector.broadcast %37 : f32 to vector<2x128xf32>
    %41 = arith.mulf %40, %39 : vector<2x128xf32>
    %42 = arith.addf %36, %41 : vector<2x128xf32>
    %c1_38 = arith.constant 1 : index
    %c2_39 = arith.constant 2 : index
    %43 = memref.load %arg3[%c1_38, %c2_39] : memref<3x4xf32, #tpu.memory_space<smem>>
    %c0_40 = arith.constant 0 : index
    %c2_41 = arith.constant 2 : index
    %c0_42 = arith.constant 0 : index
    %c0_43 = arith.constant 0 : index
    %44 = vector.load %arg2[%c0_40, %c2_41, %c0_42, %c0_43] : memref<1x4x2x128xf32, #tpu.memory_space<vmem>>, vector<1x1x2x128xf32>
    %45 = vector.shape_cast %44 : vector<1x1x2x128xf32> to vector<2x128xf32>
    %46 = vector.broadcast %43 : f32 to vector<2x128xf32>
    %47 = arith.mulf %46, %45 : vector<2x128xf32>
    %48 = arith.addf %42, %47 : vector<2x128xf32>
    %c1_44 = arith.constant 1 : index
    %c3_45 = arith.constant 3 : index
    %49 = memref.load %arg3[%c1_44, %c3_45] : memref<3x4xf32, #tpu.memory_space<smem>>
    %c0_46 = arith.constant 0 : index
    %c3_47 = arith.constant 3 : index
    %c0_48 = arith.constant 0 : index
    %c0_49 = arith.constant 0 : index
    %50 = vector.load %arg2[%c0_46, %c3_47, %c0_48, %c0_49] : memref<1x4x2x128xf32, #tpu.memory_space<vmem>>, vector<1x1x2x128xf32>
    %51 = vector.shape_cast %50 : vector<1x1x2x128xf32> to vector<2x128xf32>
    %52 = vector.broadcast %49 : f32 to vector<2x128xf32>
    %53 = arith.mulf %52, %51 : vector<2x128xf32>
    %54 = arith.addf %48, %53 : vector<2x128xf32>
    %c0_50 = arith.constant 0 : index
    %c1_51 = arith.constant 1 : index
    %c0_52 = arith.constant 0 : index
    %c0_53 = arith.constant 0 : index
    %55 = vector.load %arg5[%c0_50, %c1_51, %c0_52, %c0_53] : memref<1x3x2x128xf32, #tpu.memory_space<vmem>>, vector<1x1x2x128xf32>
    %56 = vector.shape_cast %55 : vector<1x1x2x128xf32> to vector<2x128xf32>
    %57 = vector.shape_cast %54 : vector<2x128xf32> to vector<1x1x2x128xf32>
    tpu.vector_store %arg5[%c0_50, %c1_51, %c0_52, %c0_53], %57 {strides = array<i32>} : memref<1x3x2x128xf32, #tpu.memory_space<vmem>>, vector<1x1x2x128xf32>,
    %c0_54 = arith.constant 0 : index
    %c0_55 = arith.constant 0 : index
    %c0_56 = arith.constant 0 : index
    %c0_57 = arith.constant 0 : index
    %58 = vector.load %arg2[%c0_54, %c0_55, %c0_56, %c0_57] : memref<1x4x2x128xf32, #tpu.memory_space<vmem>>, vector<1x1x2x128xf32>
    %59 = vector.shape_cast %58 : vector<1x1x2x128xf32> to vector<2x128xf32>
    %c2_58 = arith.constant 2 : index
    %c0_59 = arith.constant 0 : index
    %60 = memref.load %arg3[%c2_58, %c0_59] : memref<3x4xf32, #tpu.memory_space<smem>>
    %61 = vector.broadcast %60 : f32 to vector<2x128xf32>
    %62 = arith.mulf %59, %61 : vector<2x128xf32>
    %c2_60 = arith.constant 2 : index
    %63 = memref.load %arg4[%c2_60] : memref<3xf32, #tpu.memory_space<smem>>
    %64 = vector.broadcast %63 : f32 to vector<2x128xf32>
    %65 = arith.addf %62, %64 : vector<2x128xf32>
    %c2_61 = arith.constant 2 : index
    %c1_62 = arith.constant 1 : index
    %66 = memref.load %arg3[%c2_61, %c1_62] : memref<3x4xf32, #tpu.memory_space<smem>>
    %c0_63 = arith.constant 0 : index
    %c1_64 = arith.constant 1 : index
    %c0_65 = arith.constant 0 : index
    %c0_66 = arith.constant 0 : index
    %67 = vector.load %arg2[%c0_63, %c1_64, %c0_65, %c0_66] : memref<1x4x2x128xf32, #tpu.memory_space<vmem>>, vector<1x1x2x128xf32>
    %68 = vector.shape_cast %67 : vector<1x1x2x128xf32> to vector<2x128xf32>
    %69 = vector.broadcast %66 : f32 to vector<2x128xf32>
    %70 = arith.mulf %69, %68 : vector<2x128xf32>
    %71 = arith.addf %65, %70 : vector<2x128xf32>
    %c2_67 = arith.constant 2 : index
    %c2_68 = arith.constant 2 : index
    %72 = memref.load %arg3[%c2_67, %c2_68] : memref<3x4xf32, #tpu.memory_space<smem>>
    %c0_69 = arith.constant 0 : index
    %c2_70 = arith.constant 2 : index
    %c0_71 = arith.constant 0 : index
    %c0_72 = arith.constant 0 : index
    %73 = vector.load %arg2[%c0_69, %c2_70, %c0_71, %c0_72] : memref<1x4x2x128xf32, #tpu.memory_space<vmem>>, vector<1x1x2x128xf32>
    %74 = vector.shape_cast %73 : vector<1x1x2x128xf32> to vector<2x128xf32>
    %75 = vector.broadcast %72 : f32 to vector<2x128xf32>
    %76 = arith.mulf %75, %74 : vector<2x128xf32>
    %77 = arith.addf %71, %76 : vector<2x128xf32>
    %c2_73 = arith.constant 2 : index
    %c3_74 = arith.constant 3 : index
    %78 = memref.load %arg3[%c2_73, %c3_74] : memref<3x4xf32, #tpu.memory_space<smem>>
    %c0_75 = arith.constant 0 : index
    %c3_76 = arith.constant 3 : index
    %c0_77 = arith.constant 0 : index
    %c0_78 = arith.constant 0 : index
    %79 = vector.load %arg2[%c0_75, %c3_76, %c0_77, %c0_78] : memref<1x4x2x128xf32, #tpu.memory_space<vmem>>, vector<1x1x2x128xf32>
    %80 = vector.shape_cast %79 : vector<1x1x2x128xf32> to vector<2x128xf32>
    %81 = vector.broadcast %78 : f32 to vector<2x128xf32>
    %82 = arith.mulf %81, %80 : vector<2x128xf32>
    %83 = arith.addf %77, %82 : vector<2x128xf32>
    %c0_79 = arith.constant 0 : index
    %c2_80 = arith.constant 2 : index
    %c0_81 = arith.constant 0 : index
    %c0_82 = arith.constant 0 : index
    %84 = vector.load %arg5[%c0_79, %c2_80, %c0_81, %c0_82] : memref<1x3x2x128xf32, #tpu.memory_space<vmem>>, vector<1x1x2x128xf32>
    %85 = vector.shape_cast %84 : vector<1x1x2x128xf32> to vector<2x128xf32>
    %86 = vector.shape_cast %83 : vector<2x128xf32> to vector<1x1x2x128xf32>
    tpu.vector_store %arg5[%c0_79, %c2_80, %c0_81, %c0_82], %86 {strides = array<i32>} : memref<1x3x2x128xf32, #tpu.memory_space<vmem>>, vector<1x1x2x128xf32>,
    return
  }
  func.func @transform_0(%arg0: i32, %arg1: i32) -> (i32, i32, i32, i32) {
    %c0_i32 = arith.constant 0 : i32
    %c0_i32_0 = arith.constant 0 : i32
    %c0_i32_1 = arith.constant 0 : i32
    return %arg1, %c0_i32, %arg0, %c0_i32_0 : i32, i32, i32, i32
  }
  func.func @transform_1(%arg0: i32, %arg1: i32) -> (i32, i32) {
    %c0_i32 = arith.constant 0 : i32
    %c0_i32_0 = arith.constant 0 : i32
    %c0_i32_1 = arith.constant 0 : i32
    return %c0_i32, %c0_i32_0 : i32, i32
  }
  func.func @transform_2(%arg0: i32, %arg1: i32) -> i32 {
    %c0_i32 = arith.constant 0 : i32
    %c0_i32_0 = arith.constant 0 : i32
    return %c0_i32 : i32
  }
  func.func @transform_3(%arg0: i32, %arg1: i32) -> (i32, i32, i32, i32) {
    %c0_i32 = arith.constant 0 : i32
    %c0_i32_0 = arith.constant 0 : i32
    %c0_i32_1 = arith.constant 0 : i32
    return %arg1, %c0_i32, %arg0, %c0_i32_0 : i32, i32, i32, i32
  }
}

</mosaic_0001>

<bundles_post_ra>
// kernel: tpu_custom_call.1
= control target key start
LH: loop header
LB: loop body
LE: loop exit
PB: predicated region body
PF: predicated region fallthrough
CT: control target
= control target key end

     0   :  { %8 = vsyncpa [#allocation3], 0  ;;  %s998_s0 = inlined_call_operand.hbm [shape: f32[2,4,2,128], index: 0, kind: input, shape index: {}]   ;;  %s999_s1 = inlined_call_operand.hbm [shape: f32[3,4], index: 1, kind: input, shape index: {}]   ;;  %s1000_s2 = inlined_call_operand.vmem [shape: f32[3], index: 2, kind: input, shape index: {}]   ;;  %s1001_s3 = inlined_call_operand.hbm [shape: f32[2,3,2,128], index: 3, kind: output, shape index: {}]  }
   0x1   :  { %10 = vsyncpa [#allocation3 + $0x1], 0 }
   0x2   :  { %11 = vsyncpa [#allocation5], 0 }
   0x3   :  { %12 = vsyncpa [#allocation6], 0 }
   0x4   :  { %13 = vsyncpa [#allocation4], 0 }
   0x5   :  { %15 = vsyncpa [#allocation4 + $0x1], 0  ;;  %s737_s12 = smov 0   ;;  %s739_s13 = smov 0  }
   0x6   :  { %s741_s14 = smov 0   ;;  %s743_s15 = smov 0  }
   0x7   :  { %s745_s16 = smov 0   ;;  %s747_s17 = smov 0  }
   0x8 LB: > { %s429_s18 = sadd.s32 4294967295, %s707_s17   ;;  %s430_s19 = sadd.s32 4294967294, %s707_s17   ;;  %s707_s17 = sphi %s747_s17, %s21_s17   ;;  %s703_s16 = sphi %s745_s16, %s1022_s16   ;;  %s699_s15 = sphi %s743_s15, %s1021_s15   ;;  %s695_s14 = sphi %s741_s14, %s1020_s14   ;;  %s691_s13 = sphi %s739_s13, %s1019_s13   ;;  %s687_s12 = sphi %s737_s12, %s1018_s12  }
   0x9   : > { %s42_s20 = sadd.s32 1, %s695_s14  ;;  %p49_p0 = scmp.ne.s32.totalorder %s695_s14, %s691_s13 }
   0xa   : > { %p50_p1 = scmp.eq.s32.totalorder %s707_s17, 0  ;;  %p55_p2 = scmp.ne.s32.totalorder %s691_s13, %s687_s12 }
   0xb   : > { %p775_p3 = scmp.eq.s32.totalorder %s429_s18, 0  ;;  %p123_p4 = scmp.eq.s32.totalorder %s429_s18, 1 }
   0xc   : > { %p51_p5 = por %p50_p1, %p49_p0  ;;  %p129_p6 = scmp.eq.s32.totalorder %s430_s19, 1 }
   0xd   : > { %s1006_s21 = scalar_select %p775_p3, 1, 0 }
   0xe   : > { %p781_p7 = por %p775_p3, %p55_p2  ;;  %p785_p8 = por %p123_p4, %p49_p0 }
   0xf   : > { %p789_p9 = por %p129_p6, %p55_p2  ;;  %p431_p10 = scmp.ge.s32.totalorder %s707_s17, 1 }
  0x10   : > { %s1007_s22 = scalar_select %p781_p7, 1, 0 }
  0x11   : > { %s1008_s23 = scalar_select %p785_p8, 1, 0 }
  0x12   : > { %s1009_s24 = scalar_select %p789_p9, 1, 0 }
  0x13   : > { %p136_p11 = scmp.lt.s32.totalorder %s707_s17, 3  ;;  %p501_p1 = scmp.lt.s32.totalorder %s707_s17, 2 }
  0x14   : > { %s158_s28 = sshll.u32 %s1000_s2, 4  ;;  %s169_s4 = sand.u32 1, %s695_s14   ;;  %s159_s28 = int_to_ptr.vmem [resolvable:$true] %s158_s28 }
  0x15   : > { %p796_p13 = pnand %p431_p10, %p136_p11  ;;  %p806_p4 = pnand %p501_p1, %p51_p5 }
  0x16   : > { %s30_s5 = sadd.s32 1, %s703_s16  ;;  %s559_s8 = scalar_lea.hbm %s999_s1, 64 }
  0x17   : > { %p484_p0 = pneg %p796_p13  ;;  %p560_p5 = scmp.ne.s32.totalorder %s999_s1, %s559_s8 }
  0x18   : > { %p566_p1 = scmp.lt.u32.totalorder %s559_s8, %s999_s1 }
  0x19   : > { %p812_p2 = pnand %p484_p0, %p775_p3 }
  0x1b   : > { %p561_p6 = pneg %p812_p2 }
  0x1d   : > { %p562_p10 = pnand %p561_p6, %p560_p5 }
  0x1f   : > { %p563_p11 = pneg %p562_p10 }
  0x21   : > { %p568_p0 = pnand %p566_p1, %p563_p11 }
  0x23   : > { %571 = shalt.err (!%p568_p0)
}
  0x24   : > { %s709_s19 = smov [#allocation7]   ;;  %s572_s6 = scalar_lea.vmem %s159_s28, 16 }
  0x25   : > { %487 = dma.hbm_to_smem (!%p812_p2), %s999_s1, 64, %s709_s19, [#allocation5]  }
  0x26   : > { %p573_p12 = scmp.ne.s32.totalorder %s159_s28, %s572_s6  ;;  %p580_p3 = scmp.lt.s32.totalorder %s159_s28, %s159_s28 }
  0x27   : > { %p581_p5 = scmp.lt.s32.totalorder %s572_s6, %s572_s6 }
  0x28   : > { %p575_p9 = pnand %p573_p12, %p561_p6 }
  0x29   : > { %p582_p10 = por %p581_p5, %p580_p3 }
  0x2a   : > { %p576_p8 = pneg %p575_p9 }
  0x2c   : > { %p583_p7 = pnand %p582_p10, %p576_p8 }
  0x2e   : > { %586 = shalt.err (!%p583_p7)
}
  0x2f   : > { %s710_s7 = smov [#allocation8]   ;;  %p31_p11 = scmp.ge.s32.totalorder %s30_s5, 2 }
  0x30   : > { %490 = dma.vmem_to_smem (!%p812_p2), %s159_s28, 16, %s710_s7, [#allocation6]  }
  0x31   : > { %s435_s8 = sshll.u32 %s169_s4, 3  ;;  %s469_s9 = sshll.u32 %s703_s16, 7 }
  0x32   : > { %s1024_s5 = smov (%p31_p11, %s30_s5), 0  ;;  %s844_s30 = scalar_lea.hbm %s998_s0, %s469_s9 }
  0x33   : > { %s37_s18 = ssub.s32 %s703_s16, %s1024_s5  ;;  %s173_s19 = scalar_lea.vmem [#allocation2], %s435_s8 }
  0x34   : > { %s181_s28 = sshll.u32 %s173_s19, 4  ;;  %p40_p3 = scmp.eq.s32.totalorder %s37_s18, 0  ;;  %s848_s28 = int_to_ptr.vmem [resolvable:$true] %s181_s28 }
  0x35   : > { %s857_s27 = scalar_lea.sflag [#allocation3], %s169_s4  ;;  %s587_s6 = scalar_lea.hbm %s844_s30, 128 }
  0x36   : > { %s853_s26 = scalar_select %p40_p3, %s695_s14, %s42_s20  }
  0x37   : > { %p588_p7 = scmp.ne.s32.totalorder %s844_s30, %s587_s6  ;;  %p589_p8 = pneg %p806_p4 }
  0x38   : > { %s592_s9 = scalar_lea.hbm %s998_s0, 256  ;;  %p593_p2 = scmp.lt.u32.totalorder %s844_s30, %s998_s0 }
  0x39   : > { %p590_p9 = pnand %p589_p8, %p588_p7  ;;  %p594_p6 = scmp.lt.u32.totalorder %s592_s9, %s587_s6 }
  0x3a   : > { %p596_p0 = scmp.lt.u32.totalorder %s587_s6, %s844_s30 }
  0x3b   : > { %p591_p12 = pneg %p590_p9  ;;  %p595_p1 = por %p594_p6, %p593_p2 }
  0x3d   : > { %p597_p5 = por %p596_p0, %p595_p1 }
  0x3f   : > { %p598_p10 = pnand %p597_p5, %p591_p12 }
  0x41   : > { %601 = shalt.err (!%p598_p10)
}
  0x42   : > { %s602_s20 = scalar_lea.vmem %s848_s28, 128  ;;  %s711_s4 = smov [#allocation2]  }
  0x43   : > { %p603_p11 = scmp.ne.s32.totalorder %s848_s28, %s602_s20  ;;  %s607_s18 = sshll.u32 %s711_s4, 4  ;;  %s608_s18 = int_to_ptr.vmem [resolvable:$false] %s607_s18 }
  0x44   : > { %s609_s19 = scalar_lea.vmem %s608_s18, 256  ;;  %p610_p9 = scmp.lt.s32.totalorder %s848_s28, %s608_s18 }
  0x45   : > { %p605_p3 = pnand %p603_p11, %p589_p8  ;;  %p611_p2 = scmp.lt.s32.totalorder %s609_s19, %s602_s20 }
  0x47   : > { %p606_p7 = pneg %p605_p3  ;;  %p612_p6 = por %p611_p2, %p610_p9 }
  0x49   : > { %p613_p1 = pnand %p612_p6, %p606_p7 }
  0x4b   : > { %616 = shalt.err (!%p613_p1)
}
  0x4c   : > { %s712_s6 = smov 32   ;;  %s713_s7 = smov 2  }
  0x4d   : > { %494 = dma.hbm_to_vmem [thread:$0]  (!%p806_p4), %s844_s30, 128, %s848_s28, %s857_s27, %s712_s6, %s712_s6, %s713_s7  }
  0x4e   : > { %193 = sbr.rel (%p796_p13) target bundleno = 131 (0x83), region = 32  ;;  %s888_s8 = sand.u32 (!%p796_p13), 1, %s691_s13  }
  0x4f   : > { %s439_s9 = sshll.u32 (!%p796_p13), %s888_s8, 3  ;;  %s196_s10 = scalar_lea.sflag (!%p796_p13), [#allocation3], %s888_s8 }
  0x50   : > { %s892_s11 = scalar_lea.vmem (!%p796_p13), [#allocation2], %s439_s9  ;;  %p1013_p8 = scmp.ne.s32.totalorder (!%p796_p13), %s1007_s22, 0 }
  0x55   : > { %670 = dma.done.wait (%p1013_p8), %s196_s10, 128  }
  0x56   : > { %672 = vsyncadd (%p1013_p8), %s196_s10, 4294967168  ;;  %p1014_p4 = scmp.ne.s32.totalorder %s1006_s21, 0 }
  0x58   : > { %674 = dma.done.wait (%p1014_p4), [#allocation5], 64  }
  0x59   : > { %676 = vsyncadd (%p1014_p4), [#allocation5], 4294967232 }
  0x5a   : > { %678 = dma.done.wait (%p1014_p4), [#allocation6], 16  }
  0x5b   : > { %680 = vsyncadd (%p1014_p4), [#allocation6], 4294967280 }
  0x5c   : > { %212 = sfence }
  0x5d   : > { %s232_s25 = sld [smem:[#allocation7]]  ;;  %s442_s22 = sld [smem:[#allocation7 + $0x1]]  ;;  %v231_v0 = vld [vmem:[%s892_s11] sm:$0x3]  ;;  %v443_v1 = vld [vmem:[%s892_s11 + $0x2] sm:$0x3] }
  0x5e   : > { %s235_s29 = sld [smem:[#allocation8]]  ;;  %s444_s30 = sld [smem:[#allocation7 + $0x2]]  ;;  %v445_v3 = vld [vmem:[%s892_s11 + $0x4] sm:$0x3]  ;;  %v447_v7 = vld [vmem:[%s892_s11 + $0x6] sm:$0x3] }
  0x5f   : > { %s446_s28 = sld [smem:[#allocation7 + $0x3]]  ;;  %s448_s27 = sld [smem:[#allocation7 + $0x80]]  ;;  %v257_v10 = vld [vmem:[%s892_s11] sm:$0x3]  ;;  %v451_v14 = vld [vmem:[%s892_s11 + $0x2] sm:$0x3] }
  0x60   : > { %s908_s20 = sld [smem:[#allocation8 + $0x1]]  ;;  %s911_s21 = sld [smem:[#allocation7 + $0x82]]  ;;  %v453_v17 = vld [vmem:[%s892_s11 + $0x4] sm:$0x3]  ;;  %v455_v18 = vld [vmem:[%s892_s11 + $0x6] sm:$0x3] }
  0x61   : > { %s450_s4 = sld [smem:[#allocation7 + $0x81]]  ;;  %s913_s18 = sld [smem:[#allocation7 + $0x83]]  ;;  %v281_v26 = vld [vmem:[%s892_s11] sm:$0x3]  ;;  %v460_v27 = vld [vmem:[%s892_s11 + $0x2] sm:$0x3] }
  0x62   : > { %s916_s19 = sld [smem:[#allocation7 + $0x100]]  ;;  %s918_s6 = sld [smem:[#allocation8 + $0x2]]  ;;  %v462_v32 = vld [vmem:[%s892_s11 + $0x4] sm:$0x3]  ;;  %v464_v41 = vld [vmem:[%s892_s11 + $0x6] sm:$0x3] }
  0x63   : > { %v233_v2 = vstv %s232_s25  ;;  %v241_v6 = vstv %s442_s22  ;;  %s921_s7 = sld [smem:[#allocation7 + $0x101]]  ;;  %s923_s9 = sld [smem:[#allocation7 + $0x102]] }
  0x64   : > { %v234_v4 = vmul.f32 %v233_v2, %v231_v0  ;;  %v236_v5 = vstv %s235_s29  ;;  %v242_v8 = vmul.f32 %v443_v1, %v241_v6  ;;  %v247_v9 = vstv %s444_s30  ;;  %s926_s10 = sld [smem:[#allocation7 + $0x103]]  ;;  %s470_s25 = smul.u32 6, %s888_s8 }
  0x65   : > { %v248_v12 = vmul.f32 %v445_v3, %v247_v9  ;;  %v253_v13 = vstv %s446_s28  ;;  %v259_v16 = vstv %s448_s27  ;;  %s471_s30 = smul.u32 96, %s699_s15  ;;  %p1015_p12 = scmp.ne.s32.totalorder %s1008_s23, 0 }
  0x66   : > { %v237_v11 = vadd.f32 %v236_v5, %v234_v4  ;;  %v254_v15 = vmul.f32 %v447_v7, %v253_v13  ;;  %v260_v20 = vmul.f32 %v259_v16, %v257_v10  ;;  %v262_v21 = vstv %s908_s20  ;;  %s230_s29 = scalar_lea.vmem [#allocation9], %s470_s25  ;;  %s306_s20 = scalar_lea.sflag [#allocation4], %s888_s8 }
  0x67   : > { %v266_v22 = vstv %s450_s4  ;;  %v271_v24 = vstv %s911_s21  ;;  %v276_v25 = vstv %s913_s18  ;;  %s320_s22 = sshll.u32 %s230_s29, 4  ;;  %s949_s27 = scalar_lea.hbm %s1001_s3, %s471_s30  ;;  %s944_s22 = int_to_ptr.vmem [resolvable:$true] %s320_s22 }
  0x68   : > { %v243_v19 = vadd.f32 %v242_v8, %v237_v11  ;;  %v267_v23 = vmul.f32 %v451_v14, %v266_v22  ;;  %v263_v29 = vadd.f32 %v262_v21, %v260_v20  ;;  %v272_v30 = vmul.f32 %v453_v17, %v271_v24  ;;  %s617_s4 = scalar_lea.vmem %s944_s22, 96  ;;  %s714_s15 = smov [#allocation9]  }
  0x69   : > { %v277_v31 = vmul.f32 %v455_v18, %v276_v25  ;;  %v283_v33 = vstv %s916_s19  ;;  %v286_v34 = vstv %s918_s6  ;;  %v290_v35 = vstv %s921_s7  ;;  %p618_p13 = scmp.ne.s32.totalorder %s944_s22, %s617_s4  ;;  %s621_s21 = sshll.u32 %s714_s15, 4  ;;  %s622_s21 = int_to_ptr.vmem [resolvable:$false] %s621_s21 }
  0x6a   : > { %v249_v28 = vadd.f32 %v248_v12, %v243_v19  ;;  %v295_v36 = vstv %s923_s9  ;;  %v268_v38 = vadd.f32 %v267_v23, %v263_v29  ;;  %v284_v39 = vmul.f32 %v283_v33, %v281_v26  ;;  %s623_s18 = scalar_lea.vmem %s622_s21, 192  ;;  %p624_p10 = scmp.lt.s32.totalorder %s944_s22, %s622_s21 }
  0x6b   : > { %v291_v40 = vmul.f32 %v460_v27, %v290_v35  ;;  %v300_v42 = vstv %s926_s10  ;;  %v296_v45 = vmul.f32 %v462_v32, %v295_v36  ;;  %p619_p0 = pnand %p618_p13, %p1015_p12  ;;  %p625_p11 = scmp.lt.s32.totalorder %s623_s18, %s617_s4 }
  0x6c   : > { %v255_v37 = vadd.f32 %v254_v15, %v249_v28  ;;  %v273_v43 = vadd.f32 %v272_v30, %v268_v38  ;;  %v287_v44 = vadd.f32 %v286_v34, %v284_v39  ;;  %v301_v48 = vmul.f32 %v464_v41, %v300_v42 }
  0x6d   : > { %p620_p5 = pneg %p619_p0  ;;  %p626_p3 = por %p625_p11, %p624_p10 }
  0x6e   : > { %256 = vst [vmem:[%s230_s29] sm:$0x3] %v255_v37  ;;  %v278_v46 = vadd.f32 %v277_v31, %v273_v43  ;;  %v292_v47 = vadd.f32 %v291_v40, %v287_v44 }
  0x6f   : > { %p627_p7 = pnand %p626_p3, %p620_p5 }
  0x70   : > { %456 = vst [vmem:[%s230_s29 + $0x2] sm:$0x3] %v278_v46  ;;  %v297_v49 = vadd.f32 %v296_v45, %v292_v47 }
  0x72   : > { %v302_v50 = vadd.f32 %v301_v48, %v297_v49 }
  0x74   : > { %465 = vst [vmem:[%s230_s29 + $0x4] sm:$0x3] %v302_v50 }
  0x75   : > { %630 = shalt.err (!%p627_p7)
}
  0x76   : > { %s631_s19 = scalar_lea.hbm %s949_s27, 96  ;;  %s635_s9 = scalar_lea.hbm %s1001_s3, 192 }
  0x77   : > { %p632_p9 = scmp.ne.s32.totalorder %s949_s27, %s631_s19  ;;  %p636_p1 = scmp.lt.u32.totalorder %s949_s27, %s1001_s3 }
  0x78   : > { %p637_p8 = scmp.lt.u32.totalorder %s635_s9, %s631_s19  ;;  %p639_p13 = scmp.lt.u32.totalorder %s631_s19, %s949_s27 }
  0x79   : > { %p633_p2 = pnand %p632_p9, %p1015_p12 }
  0x7a   : > { %p638_p4 = por %p637_p8, %p636_p1 }
  0x7b   : > { %p634_p6 = pneg %p633_p2 }
  0x7c   : > { %p640_p0 = por %p639_p13, %p638_p4 }
  0x7e   : > { %p641_p5 = pnand %p640_p0, %p634_p6 }
  0x80   : > { %644 = shalt.err (!%p641_p5)
}
  0x81   : > { %s715_s29 = smov 32   ;;  %s716_s30 = smov 2  }
  0x82   : > { %482 = dma.vmem_to_hbm [thread:$0]  (%p1015_p12), %s944_s22, 96, %s949_s27, %s306_s20, %s715_s29, %s715_s29, %s716_s30  }
  0x83 PF: > { %s335_s11 = sand.u32 1, %s687_s12   ;;  %p1016_p10 = scmp.ne.s32.totalorder %s1009_s24, 0 }
  0x84   : > { %p1017_p11 = scmp.ge.s32.totalorder %s707_s17, 2  ;;  %s336_s28 = scalar_lea.sflag [#allocation4], %s335_s11 }
  0x86   : > { %p496_p3 = pnand %p1017_p11, %p1016_p10 }
  0x88   : > { %682 = dma.done.wait (!%p496_p3), %s336_s28, 96  }
  0x89   : > { %684 = vsyncadd (!%p496_p3), %s336_s28, 4294967200  ;;  %s21_s17 = sadd.s32 1, %s707_s17   ;;  %s1018_s12 = smov %s691_s13 }
  0x8a   : > { %p18_p7 = scmp.ge.s32.totalorder %s21_s17, 4   ;;  %s1019_s13 = smov %s695_s14 }
  0x8b   : > { %s1020_s14 = smov %s853_s26  ;;  %s1021_s15 = smov %s703_s16 }
  0x8c   : > { %s1022_s16 = smov %s1024_s5  ;;  %20 = sbr.rel (!%p18_p7) target bundleno = 8 (0x8), region = 92 }
  0x93   :  { %341 = vsyncpa [#allocation3], 1 }
  0x94   :  { %343 = vsyncpa [#allocation3 + $0x1], 1 }
  0x95   :  { %344 = vsyncpa [#allocation4], 1 }
  0x96   :  { %346 = vsyncpa [#allocation4 + $0x1], 1 }
  0x97   :  { %347 = vsyncpa [#allocation5], 1 }
  0x98   :  { %349 = vsyncpa [#allocation5 + $0x1], 1 }
  0x99   :  { %350 = vsyncpa [#allocation6], 1 }
  0x9a   :  { %352 = vsyncpa [#allocation6 + $0x1], 1 }

</bundles_post_ra>
